<compile_context>
chip_gen: v5e
topology: v5e:2x2
jax: 0.10.0
libtpu: 0.0.40
codegen_flags: <defaults>
</compile_context>

<pallas_src>
import jax
import jax.numpy as jnp
from jax.experimental import pallas as pl
from jax.experimental.pallas import tpu as pltpu

n_input, n_hidden, n_output = 4, 20, 3

HID_PAD = 128          # lane-dense hidden width (weight padding only; exact)
TARGET_TILE_B = 2048   # rows of x per grid step (multiple of 8); capped below


def mlp_kernel(x_ref, w1_ref, b1_ref, w2_ref, b2_ref, o_ref):
    # Two MXU matmuls + VPU bias/ReLU on one VMEM-resident tile.
    x = x_ref[...]                                                   # (TILE_B, n_input)
    h = jnp.dot(x, w1_ref[...], preferred_element_type=jnp.float32)  # (TILE_B, HID_PAD)
    h = jnp.maximum(h + b1_ref[...], 0.0)                            # bias + ReLU in f32
    y = jnp.dot(h, w2_ref[...], preferred_element_type=jnp.float32)  # (TILE_B, n_output)
    o_ref[...] = (y + b2_ref[...]).astype(o_ref.dtype)               # narrow (masked) store


def _round_up(a, m):
    return ((a + m - 1) // m) * m


def nn_model_forward(x, w1, b1, w2, b2, *, target_tile_b=TARGET_TILE_B):
    """x: (batch, n_input); w1: (n_input, n_hidden); b1: (n_hidden,) or (1, n_hidden);
    w2: (n_hidden, n_output); b2: (n_output,) or (1, n_output). Returns (batch, n_output)."""
    batch = x.shape[0]
    b1 = b1.reshape(1, -1)
    b2 = b2.reshape(1, -1)

    # Pad only the tiny weights (negligible HBM) so the hidden dim is lane-dense.
    w1p = jnp.pad(w1, ((0, 0), (0, HID_PAD - n_hidden)))
    b1p = jnp.pad(b1, ((0, 0), (0, HID_PAD - n_hidden)))
    w2p = jnp.pad(w2, ((0, HID_PAD - n_hidden), (0, 0)))

    # Big tiles amortize per-step overhead; cap so there are >= 2 grid steps
    # (keeps both v7x TensorCores fed via the "parallel" batch axis).
    tile_b = min(target_tile_b, _round_up(pl.cdiv(batch, 2), 8))
    grid = (pl.cdiv(batch, tile_b),)   # ragged last tile handled by Pallas boundary masking

    cost = pl.CostEstimate(
        flops=2 * batch * (n_input * HID_PAD + HID_PAD * n_output),
        transcendentals=0,
        bytes_accessed=4 * (batch * (n_input + n_output)
                            + n_input * HID_PAD + HID_PAD
                            + HID_PAD * n_output + n_output),
    )

    out = pl.pallas_call(
        mlp_kernel,
        out_shape=jax.ShapeDtypeStruct((batch, n_output), x.dtype),
        grid_spec=pltpu.PrefetchScalarGridSpec(
            num_scalar_prefetch=0,
            grid=grid,
            in_specs=[
                # x streams per step; last dim 4 == full array dim (legal, no pre-pad).
                pl.BlockSpec((tile_b, n_input), lambda i: (i, 0)),
                # Weights/biases: constant index_map -> fetched once, VMEM-resident.
                pl.BlockSpec((n_input, HID_PAD), lambda i: (0, 0)),
                pl.BlockSpec((1, HID_PAD), lambda i: (0, 0)),
                pl.BlockSpec((HID_PAD, n_output), lambda i: (0, 0)),
                pl.BlockSpec((1, n_output), lambda i: (0, 0)),
            ],
            # Output written directly at its logical (batch, 3) shape -- no padded
            # writeback, no wrapper slice pass.
            out_specs=pl.BlockSpec((tile_b, n_output), lambda i: (i, 0)),
        ),
        compiler_params=pltpu.CompilerParams(
            dimension_semantics=("parallel",),   # shards batch grid over 2 TCs on v7x
        ),
        cost_estimate=cost,
        # NOTE: if a trace ever shows exposed DMA per step, add
        # pipeline_mode=pl.Buffered(3) to the streamed x/out specs (secondary lever).
    )(x, w1p, b1p, w2p, b2)

    return out


def init_params(key):
    # Deterministic init mimicking torch.nn.Linear default: U(-1/sqrt(fan_in), +1/sqrt(fan_in))
    k1, k2, k3, k4 = jax.random.split(key, 4)
    bound1 = 1.0 / jnp.sqrt(jnp.float32(n_input))
    bound2 = 1.0 / jnp.sqrt(jnp.float32(n_hidden))
    w1 = jax.random.uniform(k1, (n_input, n_hidden), jnp.float32, -bound1, bound1)
    b1 = jax.random.uniform(k2, (1, n_hidden), jnp.float32, -bound1, bound1)
    w2 = jax.random.uniform(k3, (n_hidden, n_output), jnp.float32, -bound2, bound2)
    b2 = jax.random.uniform(k4, (1, n_output), jnp.float32, -bound2, bound2)
    return w1, b1, w2, b2


if __name__ == "__main__":
    key = jax.random.PRNGKey(0)
    kx, kp = jax.random.split(key)
    batch = 256  # exercises the batch grid (2 steps)
    x = jax.random.normal(kx, (batch, n_input), jnp.float32)
    w1, b1, w2, b2 = init_params(kp)

    y = nn_model_forward(x, w1, b1, w2, b2)
    jax.block_until_ready(y)

    # Plain-JAX reference of the torch forward pass.
    y_ref = jnp.maximum(x @ w1 + b1, 0.0) @ w2 + b2
    assert y.shape == (batch, n_output)
    assert jnp.allclose(y, y_ref, atol=1e-5), "mismatch vs reference"

    # Ragged batch (not a multiple of the tile): exercises boundary masking.
    y_small = nn_model_forward(x[:13], w1, b1, w2, b2)
    jax.block_until_ready(y_small)
    assert jnp.allclose(y_small, y_ref[:13], atol=1e-5), "mismatch vs reference (ragged batch)"

    # Tiny batch (smaller than one 8-row sublane tile).
    y_tiny = nn_model_forward(x[:2], w1, b1, w2, b2)
    jax.block_until_ready(y_tiny)
    assert jnp.allclose(y_tiny, y_ref[:2], atol=1e-5), "mismatch vs reference (tiny batch)"

    print("KERNEL_OK")
</pallas_src>

<mosaic_0001>
module attributes {stable_mosaic.version = 11 : i64} {
  func.func @mlp_kernel(%arg0: i32, %arg1: memref<128x4xf32, #tpu.memory_space<vmem>>, %arg2: memref<4x128xf32, #tpu.memory_space<vmem>>, %arg3: memref<1x128xf32, #tpu.memory_space<vmem>>, %arg4: memref<128x3xf32, #tpu.memory_space<vmem>>, %arg5: memref<1x3xf32, #tpu.memory_space<vmem>>, %arg6: memref<128x3xf32, #tpu.memory_space<vmem>>) attributes {dimension_semantics = [#tpu.dimension_semantics<parallel>], iteration_bounds = array<i64: 2>, scalar_prefetch = 0 : i64, scratch_operands = 0 : i64, tpu.core_type = #tpu.core_type<tc>, window_params = [{transform_indices = @transform_0, window_bounds = array<i64: 128, 4>}, {pipeline_mode = #tpu.pipeline_mode<synchronous>, transform_indices = @transform_1, window_bounds = array<i64: 4, 128>}, {pipeline_mode = #tpu.pipeline_mode<synchronous>, transform_indices = @transform_2, window_bounds = array<i64: 1, 128>}, {pipeline_mode = #tpu.pipeline_mode<synchronous>, transform_indices = @transform_3, window_bounds = array<i64: 128, 3>}, {pipeline_mode = #tpu.pipeline_mode<synchronous>, transform_indices = @transform_4, window_bounds = array<i64: 1, 3>}, {transform_indices = @transform_5, window_bounds = array<i64: 128, 3>}]} {
    %c0 = arith.constant 0 : index
    %c0_0 = arith.constant 0 : index
    %0 = vector.load %arg1[%c0, %c0_0] : memref<128x4xf32, #tpu.memory_space<vmem>>, vector<128x4xf32>
    %c0_1 = arith.constant 0 : index
    %c0_2 = arith.constant 0 : index
    %1 = vector.load %arg2[%c0_1, %c0_2] : memref<4x128xf32, #tpu.memory_space<vmem>>, vector<4x128xf32>
    %cst = arith.constant dense<0.000000e+00> : vector<128x128xf32>
    %2 = tpu.matmul %0, %1, %cst {dimension_numbers = #tpu.dot_dimension_numbers<[1], [0], [0], [1], [0, 0, 1, 1], [], []>} : vector<128x4xf32>, vector<4x128xf32>, vector<128x128xf32> -> vector<128x128xf32>
    %c0_3 = arith.constant 0 : index
    %c0_4 = arith.constant 0 : index
    %3 = vector.load %arg3[%c0_3, %c0_4] : memref<1x128xf32, #tpu.memory_space<vmem>>, vector<1x128xf32>
    %4 = vector.broadcast %3 : vector<1x128xf32> to vector<128x128xf32>
    %5 = arith.addf %2, %4 : vector<128x128xf32>
    %cst_5 = arith.constant 0.000000e+00 : f32
    %6 = vector.broadcast %cst_5 : f32 to vector<128x128xf32>
    %7 = arith.maximumf %5, %6 : vector<128x128xf32>
    %c0_6 = arith.constant 0 : index
    %c0_7 = arith.constant 0 : index
    %8 = vector.load %arg4[%c0_6, %c0_7] : memref<128x3xf32, #tpu.memory_space<vmem>>, vector<128x3xf32>
    %cst_8 = arith.constant dense<0.000000e+00> : vector<128x3xf32>
    %9 = tpu.matmul %7, %8, %cst_8 {dimension_numbers = #tpu.dot_dimension_numbers<[1], [0], [0], [1], [0, 0, 1, 1], [], []>} : vector<128x128xf32>, vector<128x3xf32>, vector<128x3xf32> -> vector<128x3xf32>
    %c0_9 = arith.constant 0 : index
    %c0_10 = arith.constant 0 : index
    %10 = vector.load %arg5[%c0_9, %c0_10] : memref<1x3xf32, #tpu.memory_space<vmem>>, vector<1x3xf32>
    %11 = vector.broadcast %10 : vector<1x3xf32> to vector<128x3xf32>
    %12 = arith.addf %9, %11 : vector<128x3xf32>
    %c0_11 = arith.constant 0 : index
    %c0_12 = arith.constant 0 : index
    %13 = vector.load %arg6[%c0_11, %c0_12] : memref<128x3xf32, #tpu.memory_space<vmem>>, vector<128x3xf32>
    tpu.vector_store %arg6[%c0_11, %c0_12], %12 {strides = array<i32>} : memref<128x3xf32, #tpu.memory_space<vmem>>, vector<128x3xf32>,
    return
  }
  func.func @transform_0(%arg0: i32) -> (i32, i32) {
    %c0_i32 = arith.constant 0 : i32
    %c0_i32_0 = arith.constant 0 : i32
    return %arg0, %c0_i32 : i32, i32
  }
  func.func @transform_1(%arg0: i32) -> (i32, i32) {
    %c0_i32 = arith.constant 0 : i32
    %c0_i32_0 = arith.constant 0 : i32
    %c0_i32_1 = arith.constant 0 : i32
    return %c0_i32, %c0_i32_0 : i32, i32
  }
  func.func @transform_2(%arg0: i32) -> (i32, i32) {
    %c0_i32 = arith.constant 0 : i32
    %c0_i32_0 = arith.constant 0 : i32
    %c0_i32_1 = arith.constant 0 : i32
    return %c0_i32, %c0_i32_0 : i32, i32
  }
  func.func @transform_3(%arg0: i32) -> (i32, i32) {
    %c0_i32 = arith.constant 0 : i32
    %c0_i32_0 = arith.constant 0 : i32
    %c0_i32_1 = arith.constant 0 : i32
    return %c0_i32, %c0_i32_0 : i32, i32
  }
  func.func @transform_4(%arg0: i32) -> (i32, i32) {
    %c0_i32 = arith.constant 0 : i32
    %c0_i32_0 = arith.constant 0 : i32
    %c0_i32_1 = arith.constant 0 : i32
    return %c0_i32, %c0_i32_0 : i32, i32
  }
  func.func @transform_5(%arg0: i32) -> (i32, i32) {
    %c0_i32 = arith.constant 0 : i32
    %c0_i32_0 = arith.constant 0 : i32
    return %arg0, %c0_i32 : i32, i32
  }
}

</mosaic_0001>

<bundles_post_ra>
// kernel: tpu_custom_call.1
= control target key start
LH: loop header
LB: loop body
LE: loop exit
PB: predicated region body
PF: predicated region fallthrough
CT: control target
= control target key end

     0   :  { %s650_s18 = smov 0   ;;  %s799_s0 = inlined_call_operand.vmem [shape: f32[256,4], index: 0, kind: input, shape index: {}]   ;;  %s800_s1 = inlined_call_operand.vmem [shape: f32[4,128], index: 1, kind: input, shape index: {}]   ;;  %s801_s2 = inlined_call_operand.vmem [shape: f32[1,128], index: 2, kind: input, shape index: {}]   ;;  %s802_s3 = inlined_call_operand.vmem [shape: f32[128,3], index: 3, kind: input, shape index: {}]   ;;  %s803_s4 = inlined_call_operand.vmem [shape: f32[1,3], index: 4, kind: input, shape index: {}]   ;;  %s804_s5 = inlined_call_operand.vmem [shape: f32[256,3], index: 5, kind: output, shape index: {}]  }
   0x1 LB: > { %s541_s19 = sadd.s32 4294967295, %s618_s18   ;;  %p545_p0 = scmp.ge.s32.totalorder %s618_s18, 1  ;;  %s618_s18 = sphi %s650_s18, %s15_s18  }
   0x2   : > { %p188_p1 = scmp.lt.s32.totalorder %s618_s18, 3 }
   0x4   : > { %p189_p2 = pnand %p545_p0, %p188_p1 }
   0x5   : > { %s546_s22 = sshll.u32 (!%p189_p2), %s541_s19, 4 }
   0x6   : > { %192 = sbr.rel (%p189_p2) target bundleno = 376 (0x178), region = 40  ;;  %p217_p3 = scmp.lt.s32.totalorder (!%p189_p2), %s546_s22, 31 }
   0xb   : > { %v244_v0 = vld [vmem:[%s800_s1] sm:$0xf]  ;;  %vm298_vm0 = vcmask 1043456   ;;  %s806_s22 = smov (!%p217_p3, %s546_s22), 31  ;;  %vm249_vm1 = vcmask 31744   ;;  %v398_v11 = vld [vmem:[%s802_s3 + $0x78] sm:$0xff] }
   0xc   : > { %550 = vmatpush.msk.msra.mxu0 %vm298_vm0, %v244_v0  ;;  %569 = vmatpush.msk.msra.mxu3 %vm298_vm0, %v244_v0  ;;  %s547_s23 = sshll.u32 %s806_s22, 3  ;;  %v397_v12 = vld [vmem:[%s802_s3 + $0x70] sm:$0xff]  ;;  %v396_v13 = vld [vmem:[%s802_s3 + $0x68] sm:$0xff]  ;;  %v395_v15 = vld [vmem:[%s802_s3 + $0x60] sm:$0xff]  ;;  %vm468_vm2 = vcmask 23552  }
   0xd   : > { %s669_s26 = scalar_lea.vmem %s799_s0, %s547_s23  ;;  %403 = vmatpush.msra.mxu1 %v398_v11  ;;  %570 = vmatpush.msra.mxu2 %v398_v11  ;;  %v394_v17 = vld [vmem:[%s802_s3 + $0x58] sm:$0xff]  ;;  %v393_v18 = vld [vmem:[%s802_s3 + $0x50] sm:$0xff]  ;;  %v392_v19 = vld [vmem:[%s802_s3 + $0x48] sm:$0xff]  ;;  %s762_s19 = scalar_lea.vmem %s804_s5, %s547_s23 }
   0xe   : > { %v228_v1 = vld [vmem:[%s669_s26] sm:$0xff]  ;;  %v229_v2 = vld [vmem:[%s669_s26 + $0x8] sm:$0xff]  ;;  %v230_v3 = vld [vmem:[%s669_s26 + $0x10] sm:$0xff]  ;;  %571 = vmatpush.msrb.mxu3 %v398_v11 }
   0xf   : > { %551 = vmatmul.msk.f32.vlgmr.msra.gmra.mxu0 %vm249_vm1, %v228_v1  ;;  %v238_v4 = vld [vmem:[%s669_s26 + $0x50] sm:$0xff]  ;;  %v231_v5 = vld [vmem:[%s669_s26 + $0x18] sm:$0xff]  ;;  %v232_v7 = vld [vmem:[%s669_s26 + $0x20] sm:$0xff]  ;;  %404 = vmatpush.msra.mxu1 %v397_v12 }
  0x10   : > { %561 = vmatmul.msk.f32.vlgmr.msra.gmra.mxu3 %vm249_vm1, %v238_v4  ;;  %v239_v6 = vld [vmem:[%s669_s26 + $0x58] sm:$0xff]  ;;  %v240_v8 = vld [vmem:[%s669_s26 + $0x60] sm:$0xff]  ;;  %v233_v9 = vld [vmem:[%s669_s26 + $0x28] sm:$0xff]  ;;  %572 = vmatpush.msra.mxu2 %v397_v12 }
  0x11   : > { %v241_v10 = vld [vmem:[%s669_s26 + $0x68] sm:$0xff]  ;;  %v234_v14 = vld [vmem:[%s669_s26 + $0x30] sm:$0xff]  ;;  %573 = vmatpush.msrb.mxu3 %v397_v12  ;;  %405 = vmatpush.msra.mxu1 %v396_v13  ;;  %v235_v20 = vld [vmem:[%s669_s26 + $0x38] sm:$0xff] }
  0x12   : > { %v242_v16 = vld [vmem:[%s669_s26 + $0x70] sm:$0xff]  ;;  %574 = vmatpush.msra.mxu2 %v396_v13  ;;  %v391_v21 = vld [vmem:[%s802_s3 + $0x40] sm:$0xff]  ;;  %v243_v22 = vld [vmem:[%s669_s26 + $0x78] sm:$0xff] }
  0x13   : > { %575 = vmatpush.msrb.mxu3 %v396_v13  ;;  %406 = vmatpush.msra.mxu1 %v395_v15  ;;  %v390_v23 = vld [vmem:[%s802_s3 + $0x38] sm:$0xff]  ;;  %v389_v24 = vld [vmem:[%s802_s3 + $0x30] sm:$0xff]  ;;  %v388_v25 = vld [vmem:[%s802_s3 + $0x28] sm:$0xff] }
  0x14   : > { %576 = vmatpush.msra.mxu2 %v395_v15  ;;  %v236_v26 = vld [vmem:[%s669_s26 + $0x40] sm:$0xff]  ;;  %v386_v28 = vld [vmem:[%s802_s3 + $0x18] sm:$0xff]  ;;  %v237_v29 = vld [vmem:[%s669_s26 + $0x48] sm:$0xff] }
  0x15   : > { %407 = vmatpush.msra.mxu1 %v394_v17  ;;  %577 = vmatpush.msrb.mxu3 %v395_v15  ;;  %v387_v27 = vld [vmem:[%s802_s3 + $0x20] sm:$0xff]  ;;  %v385_v30 = vld [vmem:[%s802_s3 + $0x10] sm:$0xff]  ;;  %v384_v31 = vld [vmem:[%s802_s3 + $0x8] sm:$0xff] }
  0x16   : > { %578 = vmatpush.msra.mxu2 %v394_v17  ;;  %v383_v32 = vld [vmem:[%s802_s3] sm:$0xff] }
  0x17   : > { %552 = vmatmul.msk.f32.gmra.mxu0 %vm249_vm1, %v229_v2  ;;  %408 = vmatpush.msra.mxu1 %v393_v18  ;;  %v610_v33 = vld [vmem:[%s801_s2] ss:$0 sm:$0xff] }
  0x18   : > { %562 = vmatmul.msk.f32.gmra.mxu3 %vm249_vm1, %v239_v6  ;;  %580 = vmatpush.msra.mxu2 %v393_v18 }
  0x19   : > { %579 = vmatpush.msrb.mxu3 %v394_v17  ;;  %409 = vmatpush.msra.mxu1 %v392_v19 }
  0x1a   : > { %582 = vmatpush.msra.mxu2 %v392_v19 }
  0x1b   : > { %581 = vmatpush.msrb.mxu3 %v393_v18  ;;  %410 = vmatpush.msra.mxu1 %v391_v21  ;;  %v611_v18 = vld [vmem:[%s803_s4] ss:$0 sm:$0xff] }
  0x1c   : > { %584 = vmatpush.msra.mxu2 %v391_v21 }
  0x1d   : > { %411 = vmatpush.msra.mxu1 %v390_v23  ;;  %583 = vmatpush.msrb.mxu3 %v392_v19 }
  0x1e   : > { %586 = vmatpush.msra.mxu2 %v390_v23 }
  0x1f   : > { %553 = vmatmul.msk.f32.gmra.mxu0 %vm249_vm1, %v230_v3  ;;  %412 = vmatpush.msra.mxu1 %v389_v24 }
  0x20   : > { %563 = vmatmul.msk.f32.gmra.mxu3 %vm249_vm1, %v240_v8  ;;  %588 = vmatpush.msra.mxu2 %v389_v24 }
  0x21   : > { %585 = vmatpush.msrb.mxu3 %v391_v21  ;;  %413 = vmatpush.msra.mxu1 %v388_v25 }
  0x22   : > { %590 = vmatpush.msra.mxu2 %v388_v25 }
  0x23   : > { %587 = vmatpush.msrb.mxu3 %v390_v23  ;;  %414 = vmatpush.msra.mxu1 %v387_v27 }
  0x24   : > { %592 = vmatpush.msra.mxu2 %v387_v27 }
  0x25   : > { %589 = vmatpush.msrb.mxu3 %v389_v24  ;;  %415 = vmatpush.msra.mxu1 %v386_v28 }
  0x26   : > { %594 = vmatpush.msra.mxu2 %v386_v28 }
  0x27   : > { %554 = vmatmul.msk.f32.gmra.mxu0 %vm249_vm1, %v231_v5  ;;  %591 = vmatpush.msrb.mxu3 %v388_v25 }
  0x28   : > { %564 = vmatmul.msk.f32.gmra.mxu3 %vm249_vm1, %v241_v10  ;;  %416 = vmatpush.msra.mxu1 %v385_v30 }
  0x29   : > { %593 = vmatpush.msrb.mxu3 %v387_v27  ;;  %596 = vmatpush.msra.mxu2 %v385_v30 }
  0x2a   : > { %417 = vmatpush.msra.mxu1 %v384_v31 }
  0x2b   : > { %595 = vmatpush.msrb.mxu3 %v386_v28  ;;  %598 = vmatpush.msra.mxu2 %v384_v31 }
  0x2c   : > { %418 = vmatpush.msra.mxu1 %v383_v32 }
  0x2d   : > { %597 = vmatpush.msrb.mxu3 %v385_v30  ;;  %600 = vmatpush.msra.mxu2 %v383_v32 }
  0x2f   : > { %555 = vmatmul.msk.f32.gmra.mxu0 %vm249_vm1, %v232_v7  ;;  %599 = vmatpush.msrb.mxu3 %v384_v31 }
  0x30   : > { %565 = vmatmul.msk.f32.gmra.mxu3 %vm249_vm1, %v242_v16 }
  0x31   : > { %601 = vmatpush.msrb.mxu3 %v383_v32 }
  0x37   : > { %556 = vmatmul.msk.f32.gmra.mxu0 %vm249_vm1, %v233_v9 }
  0x38   : > { %566 = vmatmul.msk.f32.gmra.mxu3 %vm249_vm1, %v243_v22 }
  0x3f   : > { %557 = vmatmul.msk.f32.gmra.mxu0 %vm249_vm1, %v234_v14 }
  0x47   : > { %558 = vmatmul.msk.f32.gmra.mxu0 %vm249_vm1, %v235_v20 }
  0x4f   : > { %559 = vmatmul.msk.f32.gmra.mxu0 %vm249_vm1, %v236_v26 }
  0x57   : > { %560 = vmatmul.msk.f32.gmra.mxu0 %vm249_vm1, %v237_v29 }
  0x8c   : > { %v319_v34 = vpop.f32.mrf.mxu0 }
  0x8d   : > { %v320_v35 = vadd.f32 %v610_v33, %v319_v34 }
  0x8f   : > { %v367_v36 = vmax.f32 %v320_v35, 0.0 }
  0x91   : > { %419 = vmatmul.f32.vlgmr.msra.gmra.mxu1 %v367_v36 }
  0x93   : > { %v349_v44 = vpop.f32.mrf.mxu3 }
  0x94   : > { %v322_v37 = vpop.f32.mrf.mxu0  ;;  %v350_v12 = vadd.f32 %v610_v33, %v349_v44 }
  0x95   : > { %v323_v38 = vadd.f32 %v610_v33, %v322_v37 }
  0x96   : > { %v377_v13 = vmax.f32 %v350_v12, 0.0 }
  0x97   : > { %v368_v39 = vmax.f32 %v323_v38, 0.0 }
  0x99   : > { %422 = vmatmul.f32.gmra.mxu1 %v368_v39 }
  0x9b   : > { %v352_v48 = vpop.f32.mrf.mxu3 }
  0x9c   : > { %v325_v40 = vpop.f32.mrf.mxu0  ;;  %v353_v14 = vadd.f32 %v610_v33, %v352_v48 }
  0x9d   : > { %v326_v41 = vadd.f32 %v610_v33, %v325_v40 }
  0x9e   : > { %v378_v15 = vmax.f32 %v353_v14, 0.0 }
  0x9f   : > { %v369_v42 = vmax.f32 %v326_v41, 0.0 }
  0xa1   : > { %425 = vmatmul.f32.gmra.mxu1 %v369_v42 }
  0xa3   : > { %v355_v52 = vpop.f32.mrf.mxu3 }
  0xa4   : > { %v328_v43 = vpop.f32.mrf.mxu0  ;;  %v356_v16 = vadd.f32 %v610_v33, %v355_v52 }
  0xa5   : > { %v329_v45 = vadd.f32 %v610_v33, %v328_v43 }
  0xa6   : > { %v379_v17 = vmax.f32 %v356_v16, 0.0 }
  0xa7   : > { %v370_v46 = vmax.f32 %v329_v45, 0.0 }
  0xa9   : > { %428 = vmatmul.f32.gmra.mxu1 %v370_v46 }
  0xab   : > { %v358_v56 = vpop.f32.mrf.mxu3 }
  0xac   : > { %v331_v47 = vpop.f32.mrf.mxu0  ;;  %v359_v58 = vadd.f32 %v610_v33, %v358_v56 }
  0xad   : > { %v332_v49 = vadd.f32 %v610_v33, %v331_v47 }
  0xae   : > { %v380_v60 = vmax.f32 %v359_v58, 0.0 }
  0xaf   : > { %v371_v50 = vmax.f32 %v332_v49, 0.0 }
  0xb0   : > { %458 = vmatmul.f32.vlgmr.msrb.gmra.mxu3 %v380_v60 }
  0xb1   : > { %431 = vmatmul.f32.gmra.mxu1 %v371_v50 }
  0xb3   : > { %v361_v62 = vpop.f32.mrf.mxu3 }
  0xb4   : > { %v334_v51 = vpop.f32.mrf.mxu0  ;;  %v362_v0 = vadd.f32 %v610_v33, %v361_v62 }
  0xb5   : > { %v335_v53 = vadd.f32 %v610_v33, %v334_v51 }
  0xb6   : > { %v381_v2 = vmax.f32 %v362_v0, 0.0 }
  0xb7   : > { %v372_v54 = vmax.f32 %v335_v53, 0.0 }
  0xb8   : > { %461 = vmatmul.f32.gmra.mxu3 %v381_v2 }
  0xb9   : > { %434 = vmatmul.f32.gmra.mxu1 %v372_v54 }
  0xbb   : > { %v364_v4 = vpop.f32.mrf.mxu3 }
  0xbc   : > { %v337_v55 = vpop.f32.mrf.mxu0  ;;  %v365_v6 = vadd.f32 %v610_v33, %v364_v4 }
  0xbd   : > { %v338_v57 = vadd.f32 %v610_v33, %v337_v55 }
  0xbe   : > { %v382_v8 = vmax.f32 %v365_v6, 0.0 }
  0xbf   : > { %v373_v59 = vmax.f32 %v338_v57, 0.0 }
  0xc0   : > { %464 = vmatmul.f32.gmra.mxu3 %v382_v8 }
  0xc1   : > { %437 = vmatmul.f32.vlgmr.msra.gmra.mxu2 %v373_v59 }
  0xc4   : > { %v340_v61 = vpop.f32.mrf.mxu0 }
  0xc5   : > { %v341_v63 = vadd.f32 %v610_v33, %v340_v61 }
  0xc7   : > { %v374_v1 = vmax.f32 %v341_v63, 0.0 }
  0xc9   : > { %440 = vmatmul.f32.gmra.mxu2 %v374_v1 }
  0xcc   : > { %v343_v3 = vpop.f32.mrf.mxu0 }
  0xcd   : > { %v344_v5 = vadd.f32 %v610_v33, %v343_v3 }
  0xcf   : > { %v375_v7 = vmax.f32 %v344_v5, 0.0 }
  0xd1   : > { %443 = vmatmul.f32.gmra.mxu2 %v375_v7 }
  0xd4   : > { %v346_v9 = vpop.f32.mrf.mxu0 }
  0xd5   : > { %v347_v10 = vadd.f32 %v610_v33, %v346_v9 }
  0xd7   : > { %v376_v11 = vmax.f32 %v347_v10, 0.0 }
  0xd9   : > { %446 = vmatmul.f32.gmra.mxu2 %v376_v11 }
  0xe1   : > { %449 = vmatmul.f32.gmra.mxu2 %v377_v13 }
  0xe9   : > { %452 = vmatmul.f32.gmra.mxu2 %v378_v15 }
  0xf1   : > { %455 = vmatmul.f32.gmra.mxu2 %v379_v17 }
 0x10e   : > { %v420_v19 = vpop.f32.mrf.mxu1 }
 0x10f   : > { %v421_v20 = vadd.f32 %v611_v18, %v420_v19 }
 0x111   : > { %469 = vst.msk [vmem:[%s762_s19] sm:$0xff] %vm468_vm2, %v421_v20 }
 0x116   : > { %v423_v21 = vpop.f32.mrf.mxu1 }
 0x117   : > { %v424_v22 = vadd.f32 %v611_v18, %v423_v21 }
 0x119   : > { %470 = vst.msk [vmem:[%s762_s19 + $0x8] sm:$0xff] %vm468_vm2, %v424_v22 }
 0x11e   : > { %v426_v23 = vpop.f32.mrf.mxu1 }
 0x11f   : > { %v427_v24 = vadd.f32 %v611_v18, %v426_v23 }
 0x121   : > { %471 = vst.msk [vmem:[%s762_s19 + $0x10] sm:$0xff] %vm468_vm2, %v427_v24 }
 0x126   : > { %v429_v25 = vpop.f32.mrf.mxu1 }
 0x127   : > { %v430_v26 = vadd.f32 %v611_v18, %v429_v25 }
 0x129   : > { %472 = vst.msk [vmem:[%s762_s19 + $0x18] sm:$0xff] %vm468_vm2, %v430_v26 }
 0x12e   : > { %v432_v27 = vpop.f32.mrf.mxu1 }
 0x12f   : > { %v433_v28 = vadd.f32 %v611_v18, %v432_v27 }
 0x131   : > { %473 = vst.msk [vmem:[%s762_s19 + $0x20] sm:$0xff] %vm468_vm2, %v433_v28 }
 0x133   : > { %v459_v32 = vpop.f32.mrf.mxu3 }
 0x134   : > { %v460_v34 = vadd.f32 %v611_v18, %v459_v32 }
 0x136   : > { %v435_v29 = vpop.f32.mrf.mxu1  ;;  %482 = vst.msk [vmem:[%s762_s19 + $0x68] sm:$0xff] %vm468_vm2, %v460_v34 }
 0x137   : > { %v436_v30 = vadd.f32 %v611_v18, %v435_v29 }
 0x139   : > { %474 = vst.msk [vmem:[%s762_s19 + $0x28] sm:$0xff] %vm468_vm2, %v436_v30 }
 0x13b   : > { %v462_v36 = vpop.f32.mrf.mxu3 }
 0x13c   : > { %v463_v38 = vadd.f32 %v611_v18, %v462_v36 }
 0x13e   : > { %483 = vst.msk [vmem:[%s762_s19 + $0x70] sm:$0xff] %vm468_vm2, %v463_v38 }
 0x143   : > { %v465_v40 = vpop.f32.mrf.mxu3 }
 0x144   : > { %v438_v31 = vpop.f32.mrf.mxu2  ;;  %v466_v42 = vadd.f32 %v611_v18, %v465_v40 }
 0x145   : > { %v439_v33 = vadd.f32 %v611_v18, %v438_v31 }
 0x146   : > { %484 = vst.msk [vmem:[%s762_s19 + $0x78] sm:$0xff] %vm468_vm2, %v466_v42 }
 0x147   : > { %475 = vst.msk [vmem:[%s762_s19 + $0x30] sm:$0xff] %vm468_vm2, %v439_v33 }
 0x14c   : > { %v441_v35 = vpop.f32.mrf.mxu2 }
 0x14d   : > { %v442_v37 = vadd.f32 %v611_v18, %v441_v35 }
 0x14f   : > { %476 = vst.msk [vmem:[%s762_s19 + $0x38] sm:$0xff] %vm468_vm2, %v442_v37 }
 0x154   : > { %v444_v39 = vpop.f32.mrf.mxu2 }
 0x155   : > { %v445_v41 = vadd.f32 %v611_v18, %v444_v39 }
 0x157   : > { %477 = vst.msk [vmem:[%s762_s19 + $0x40] sm:$0xff] %vm468_vm2, %v445_v41 }
 0x15c   : > { %v447_v43 = vpop.f32.mrf.mxu2 }
 0x15d   : > { %v448_v44 = vadd.f32 %v611_v18, %v447_v43 }
 0x15f   : > { %478 = vst.msk [vmem:[%s762_s19 + $0x48] sm:$0xff] %vm468_vm2, %v448_v44 }
 0x164   : > { %v450_v45 = vpop.f32.mrf.mxu2 }
 0x165   : > { %v451_v46 = vadd.f32 %v611_v18, %v450_v45 }
 0x167   : > { %479 = vst.msk [vmem:[%s762_s19 + $0x50] sm:$0xff] %vm468_vm2, %v451_v46 }
 0x16c   : > { %v453_v47 = vpop.f32.mrf.mxu2 }
 0x16d   : > { %v454_v48 = vadd.f32 %v611_v18, %v453_v47 }
 0x16f   : > { %480 = vst.msk [vmem:[%s762_s19 + $0x58] sm:$0xff] %vm468_vm2, %v454_v48 }
 0x174   : > { %v456_v49 = vpop.f32.mrf.mxu2 }
 0x175   : > { %v457_v50 = vadd.f32 %v611_v18, %v456_v49 }
 0x177   : > { %481 = vst.msk [vmem:[%s762_s19 + $0x60] sm:$0xff] %vm468_vm2, %v457_v50 }
 0x178 PF: > { %s15_s18 = sadd.s32 1, %s618_s18  }
 0x179   : > { %p12_p4 = scmp.ge.s32.totalorder %s15_s18, 4  }
 0x17b   :  { %14 = sbr.rel (!%p12_p4) target bundleno = 1 (0x1), region = 70 }

</bundles_post_ra>
